<compile_context>
chip_gen: v6e
topology: v6e:2x2x1
jax: 0.10.0
libtpu: 0.0.40
codegen_flags: <defaults>
</compile_context>

<pallas_src>
import jax
import jax.numpy as jnp
from jax.experimental import pallas as pl
from jax.experimental.pallas import tpu as pltpu

BN_EPS = 1e-5


def _round_up(v, m):
    return (v + m - 1) // m * m


def _make_seg_kernel(num_rest_layers):
    """x (C_pf, T) -> relu(W0 @ x + t0[b]) -> [relu(W @ h + t)]* -> Wf @ h + bf."""

    def kernel(x_ref, t0_ref, w0_ref, *rest):
        out_ref = rest[-1]
        params = rest[:-1]
        x = x_ref[0].astype(jnp.bfloat16)                       # cast in-kernel, no HBM pass
        h = jnp.dot(w0_ref[...], x, preferred_element_type=jnp.float32)
        # fused bias + ReLU + bf16 downcast: only the bf16 slab is materialized.
        h = jnp.maximum(h + t0_ref[0], 0.0).astype(jnp.bfloat16)
        idx = 0
        for _ in range(num_rest_layers):
            w_ref, t_ref = params[idx], params[idx + 1]
            idx += 2
            h = jnp.dot(w_ref[...], h, preferred_element_type=jnp.float32)
            h = jnp.maximum(h + t_ref[...], 0.0).astype(jnp.bfloat16)
        wf_ref, bf_ref = params[idx], params[idx + 1]
        y = jnp.dot(wf_ref[...], h, preferred_element_type=jnp.float32) + bf_ref[...]
        out_ref[0] = y.astype(out_ref.dtype)

    return kernel


def linear_segmentator_pallas(point_features, t0, w0, rest_layers, w_final,
                              b_final, *, tile_n=2048, out_dtype=jnp.float32):
    """Fused segmentator stack (eval mode), channels-first in / channels-first out.

    point_features: (B, C_pf, N) f32 — PyTorch NCL layout, fed in untouched.
    t0:   (B, C1, 1) f32 — per-batch folded first-layer bias
          (cls_map contribution + conv bias + BN, already scaled).
    w0:   (C1, C_pf) — first-layer weight for the point-feature channels, BN-folded.
    rest_layers: list of (W (C_out, C_in), t (C_out, 1)) folded hidden layers.
    w_final, b_final: (NUM_CLASS, C_last), (NUM_CLASS, 1).
    Returns logits in NCL layout: (B, NUM_CLASS, N), dtype out_dtype.
    """
    B, c_pf, n = point_features.shape
    c1 = w0.shape[0]
    ncls = w_final.shape[0]

    # Clamp the tile to the (128-rounded) problem size; Pallas masks the ragged tail.
    tile_n = max(128, min(tile_n, _round_up(n, 128)))
    # v7x megacore: keep >= 2 grid steps so both TensorCores get work (B>=2 already
    # provides parity; only split N when B == 1).
    if B * pl.cdiv(n, tile_n) < 2 and n > 128:
        tile_n = max(128, _round_up(pl.cdiv(n, 2), 128))
    assert tile_n % 128 == 0
    grid = (B, pl.cdiv(n, tile_n))

    # bf16 MXU weight operands (tiny, cast once in the wrapper); biases stay f32.
    w0 = w0.astype(jnp.bfloat16)
    rest_layers = [(w.astype(jnp.bfloat16), t.astype(jnp.float32))
                   for (w, t) in rest_layers]
    w_final = w_final.astype(jnp.bfloat16)

    operands = [point_features, t0.astype(jnp.float32), w0]
    in_specs = [
        # Only this spec would need pipeline_mode=pl.Buffered(3) — and only if an
        # xprof trace at large tile_n shows the input DMA exposed.
        pl.BlockSpec((1, c_pf, tile_n), lambda b, i: (b, 0, i)),
        pl.BlockSpec((1, c1, 1), lambda b, i: (b, 0, 0)),
        pl.BlockSpec(w0.shape, lambda b, i: (0, 0)),
    ]
    for (w, t) in rest_layers:
        operands += [w, t]
        in_specs += [pl.BlockSpec(w.shape, lambda b, i: (0, 0)),
                     pl.BlockSpec(t.shape, lambda b, i: (0, 0))]
    operands += [w_final, b_final.astype(jnp.float32)]
    in_specs += [pl.BlockSpec(w_final.shape, lambda b, i: (0, 0)),
                 pl.BlockSpec(b_final.shape, lambda b, i: (0, 0))]

    return pl.pallas_call(
        _make_seg_kernel(len(rest_layers)),
        out_shape=jax.ShapeDtypeStruct((B, ncls, n), out_dtype),
        grid=grid,
        in_specs=in_specs,
        out_specs=pl.BlockSpec((1, ncls, tile_n), lambda b, i: (b, 0, i)),
        compiler_params=pltpu.CompilerParams(
            dimension_semantics=("parallel", "parallel")),
    )(*operands)


# ----------------------------------------------------------------------------
# Parameter construction / tiny JAX glue (cls_map operates on a single token).
# ----------------------------------------------------------------------------

def _conv_bn_params(key, cin, cout):
    k1, k2, k3, k4, k5, k6 = jax.random.split(key, 6)
    w = jax.random.normal(k1, (cout, cin), jnp.float32) * 0.1    # Conv1d weight (k=1)
    b = jax.random.normal(k2, (cout,), jnp.float32) * 0.1        # Conv1d bias
    g = 1.0 + 0.1 * jax.random.normal(k3, (cout,), jnp.float32)  # BN gamma
    beta = 0.1 * jax.random.normal(k4, (cout,), jnp.float32)     # BN beta
    mean = 0.1 * jax.random.normal(k5, (cout,), jnp.float32)     # BN running_mean
    var = 0.5 + jax.random.uniform(k6, (cout,), jnp.float32)     # BN running_var
    return w, b, g, beta, mean, var


def _fold_conv_bn(w, b, g, beta, mean, var):
    """Conv1d(k=1)+BN(eval) -> (W', t') with y = W' @ x + t'."""
    scale = g * jax.lax.rsqrt(var + BN_EPS)
    return w * scale[:, None], (scale * (b - mean) + beta)[:, None]


def _cls_map_forward(cls_in_b16t, params):
    """cls_in_b16t: (B, 16, 1). params: two (w, b, g, beta, mean, var) tuples."""
    x = cls_in_b16t
    for (w, b, g, beta, mean, var) in params:
        x = jnp.einsum('oi,bit->bot', w, x) + b[None, :, None]
        x = ((x - mean[None, :, None]) * jax.lax.rsqrt(var + BN_EPS)[None, :, None]
             * g[None, :, None] + beta[None, :, None])
        x = jnp.maximum(x, 0.0)
    return x


if __name__ == "__main__":
    # Synthetic config:
    #   NETWORK.HEAD.SEGMENTATOR.IN_CHANNELS = [128]  (point feats 64 + cls_map 64)
    #   NETWORK.HEAD.SEGMENTATOR.DIMS        = [128, 64]
    #   DATASET.NUM_CLASS                    = 8
    B, N, C_PF, NUM_CLASS = 2, 500, 64, 8         # N=500 exercises the ragged-N masking
    DIMS = [128, 64]
    IN_CHANNELS = [C_PF + 64]

    key = jax.random.PRNGKey(0)
    keys = iter(jax.random.split(key, 16))

    # inputs (data_dic)
    point_features = jax.random.normal(next(keys), (B, C_PF, N), jnp.float32)  # (B,C,N)
    cls_tokens = jnp.array([[3], [11]], dtype=jnp.int32)                        # (B,1)

    # cls_map params: Conv1d(16->64)+BN+ReLU, Conv1d(64->64)+BN+ReLU
    cls_params = [_conv_bn_params(next(keys), 16, 64),
                  _conv_bn_params(next(keys), 64, 64)]

    # raw segmentator params
    seg_raw = [_conv_bn_params(next(keys), cin, cout)
               for cin, cout in zip(IN_CHANNELS + DIMS[:-1], DIMS)]
    wf = jax.random.normal(next(keys), (NUM_CLASS, DIMS[-1]), jnp.float32) * 0.1
    bf = jax.random.normal(next(keys), (NUM_CLASS,), jnp.float32) * 0.1

    # ---- JAX glue: to_categorical + permute + cls_map on the single token ----
    onehot = jax.nn.one_hot(cls_tokens, 16, dtype=jnp.float32)                  # (B,1,16)
    cls_feat = _cls_map_forward(jnp.transpose(onehot, (0, 2, 1)), cls_params)   # (B,64,1)

    # ---- fold params for the kernel ----
    # layer 0: split W into point-feature / cls halves; cls half + conv bias + BN
    # collapse into a per-batch bias, so the concat/broadcast never hits HBM.
    w1, b1, g1, beta1, mean1, var1 = seg_raw[0]
    scale1 = g1 * jax.lax.rsqrt(var1 + BN_EPS)
    w0_pf = w1[:, :C_PF] * scale1[:, None]                                      # (128,64)
    w0_cls = w1[:, C_PF:]                                                       # (128,64)
    t0 = (scale1[None, :, None]
          * (jnp.einsum('oc,bct->bot', w0_cls, cls_feat)
             + (b1 - mean1)[None, :, None])
          + beta1[None, :, None])                                               # (B,128,1)
    rest = [_fold_conv_bn(*p) for p in seg_raw[1:]]
    b_final = bf[:, None]

    # ---- Pallas forward (hot path) ----
    logits_ncl = linear_segmentator_pallas(point_features, t0, w0_pf, rest,
                                           wf, b_final)                         # (B,8,N)
    pred_score_logits = jnp.transpose(logits_ncl, (0, 2, 1))                    # (B,N,8)
    jax.block_until_ready(pred_score_logits)
    assert pred_score_logits.shape == (B, N, NUM_CLASS)

    # ---- reference 1: full-f32 PyTorch-semantics forward ----
    def conv_bn_relu(x, w, b, g, beta, mean, var):
        z = jnp.einsum('oc,bcn->bon', w, x) + b[None, :, None]
        z = ((z - mean[None, :, None]) * jax.lax.rsqrt(var + BN_EPS)[None, :, None]
             * g[None, :, None] + beta[None, :, None])
        return jnp.maximum(z, 0.0)

    ref = jnp.concatenate(
        [point_features, jnp.broadcast_to(cls_feat, (B, 64, N))], axis=1)
    for p in seg_raw:
        ref = conv_bn_relu(ref, *p)
    ref = jnp.einsum('oc,bcn->bon', wf, ref) + bf[None, :, None]
    ref_f32 = jnp.transpose(ref, (0, 2, 1))

    # ---- reference 2: bf16-matched (same folded params / casts as the kernel) ----
    h = jnp.einsum('oc,bcn->bon', w0_pf.astype(jnp.bfloat16),
                   point_features.astype(jnp.bfloat16),
                   preferred_element_type=jnp.float32)
    h = jnp.maximum(h + t0, 0.0).astype(jnp.bfloat16)
    for (w, t) in rest:
        h = jnp.einsum('oc,bcn->bon', w.astype(jnp.bfloat16), h,
                       preferred_element_type=jnp.float32)
        h = jnp.maximum(h + t[None], 0.0).astype(jnp.bfloat16)
    h = jnp.einsum('oc,bcn->bon', wf.astype(jnp.bfloat16), h,
                   preferred_element_type=jnp.float32) + b_final[None]
    ref_bf16 = jnp.transpose(h, (0, 2, 1))

    assert jnp.allclose(pred_score_logits, ref_bf16, atol=1e-3, rtol=1e-3)
    assert jnp.allclose(pred_score_logits, ref_f32, atol=5e-2, rtol=5e-2)

    print("KERNEL_OK")
</pallas_src>

<mosaic_0001>
module attributes {stable_mosaic.version = 11 : i64} {
  func.func @kernel(%arg0: i32, %arg1: i32, %arg2: memref<1x64x512xf32, #tpu.memory_space<vmem>>, %arg3: memref<1x128x1xf32, #tpu.memory_space<vmem>>, %arg4: memref<128x64xbf16, #tpu.memory_space<vmem>>, %arg5: memref<64x128xbf16, #tpu.memory_space<vmem>>, %arg6: memref<64x1xf32, #tpu.memory_space<vmem>>, %arg7: memref<8x64xbf16, #tpu.memory_space<vmem>>, %arg8: memref<8x1xf32, #tpu.memory_space<vmem>>, %arg9: memref<1x8x512xf32, #tpu.memory_space<vmem>>) attributes {dimension_semantics = [#tpu.dimension_semantics<parallel>, #tpu.dimension_semantics<parallel>], iteration_bounds = array<i64: 2, 1>, scalar_prefetch = 0 : i64, scratch_operands = 0 : i64, tpu.core_type = #tpu.core_type<tc>, window_params = [{transform_indices = @transform_0, window_bounds = array<i64: 1, 64, 512>}, {transform_indices = @transform_1, window_bounds = array<i64: 1, 128, 1>}, {pipeline_mode = #tpu.pipeline_mode<synchronous>, transform_indices = @transform_2, window_bounds = array<i64: 128, 64>}, {pipeline_mode = #tpu.pipeline_mode<synchronous>, transform_indices = @transform_3, window_bounds = array<i64: 64, 128>}, {pipeline_mode = #tpu.pipeline_mode<synchronous>, transform_indices = @transform_4, window_bounds = array<i64: 64, 1>}, {pipeline_mode = #tpu.pipeline_mode<synchronous>, transform_indices = @transform_5, window_bounds = array<i64: 8, 64>}, {pipeline_mode = #tpu.pipeline_mode<synchronous>, transform_indices = @transform_6, window_bounds = array<i64: 8, 1>}, {transform_indices = @transform_7, window_bounds = array<i64: 1, 8, 512>}]} {
    %c0 = arith.constant 0 : index
    %c0_0 = arith.constant 0 : index
    %c0_1 = arith.constant 0 : index
    %0 = vector.load %arg2[%c0, %c0_0, %c0_1] : memref<1x64x512xf32, #tpu.memory_space<vmem>>, vector<1x64x512xf32>
    %1 = vector.shape_cast %0 : vector<1x64x512xf32> to vector<64x512xf32>
    %2 = arith.truncf %1 : vector<64x512xf32> to vector<64x512xbf16>
    %c0_2 = arith.constant 0 : index
    %c0_3 = arith.constant 0 : index
    %3 = vector.load %arg4[%c0_2, %c0_3] : memref<128x64xbf16, #tpu.memory_space<vmem>>, vector<128x64xbf16>
    %cst = arith.constant dense<0.000000e+00> : vector<128x512xf32>
    %4 = tpu.matmul %3, %2, %cst {dimension_numbers = #tpu.dot_dimension_numbers<[1], [0], [0], [1], [0, 0, 1, 1], [], []>} : vector<128x64xbf16>, vector<64x512xbf16>, vector<128x512xf32> -> vector<128x512xf32>
    %c0_4 = arith.constant 0 : index
    %c0_5 = arith.constant 0 : index
    %c0_6 = arith.constant 0 : index
    %5 = vector.load %arg3[%c0_4, %c0_5, %c0_6] : memref<1x128x1xf32, #tpu.memory_space<vmem>>, vector<1x128x1xf32>
    %6 = vector.shape_cast %5 : vector<1x128x1xf32> to vector<128x1xf32>
    %7 = vector.broadcast %6 : vector<128x1xf32> to vector<128x512xf32>
    %8 = arith.addf %4, %7 : vector<128x512xf32>
    %cst_7 = arith.constant 0.000000e+00 : f32
    %9 = vector.broadcast %cst_7 : f32 to vector<128x512xf32>
    %10 = arith.maximumf %8, %9 : vector<128x512xf32>
    %11 = arith.truncf %10 : vector<128x512xf32> to vector<128x512xbf16>
    %c0_8 = arith.constant 0 : index
    %c0_9 = arith.constant 0 : index
    %12 = vector.load %arg5[%c0_8, %c0_9] : memref<64x128xbf16, #tpu.memory_space<vmem>>, vector<64x128xbf16>
    %cst_10 = arith.constant dense<0.000000e+00> : vector<64x512xf32>
    %13 = tpu.matmul %12, %11, %cst_10 {dimension_numbers = #tpu.dot_dimension_numbers<[1], [0], [0], [1], [0, 0, 1, 1], [], []>} : vector<64x128xbf16>, vector<128x512xbf16>, vector<64x512xf32> -> vector<64x512xf32>
    %c0_11 = arith.constant 0 : index
    %c0_12 = arith.constant 0 : index
    %14 = vector.load %arg6[%c0_11, %c0_12] : memref<64x1xf32, #tpu.memory_space<vmem>>, vector<64x1xf32>
    %15 = vector.broadcast %14 : vector<64x1xf32> to vector<64x512xf32>
    %16 = arith.addf %13, %15 : vector<64x512xf32>
    %cst_13 = arith.constant 0.000000e+00 : f32
    %17 = vector.broadcast %cst_13 : f32 to vector<64x512xf32>
    %18 = arith.maximumf %16, %17 : vector<64x512xf32>
    %19 = arith.truncf %18 : vector<64x512xf32> to vector<64x512xbf16>
    %c0_14 = arith.constant 0 : index
    %c0_15 = arith.constant 0 : index
    %20 = vector.load %arg7[%c0_14, %c0_15] : memref<8x64xbf16, #tpu.memory_space<vmem>>, vector<8x64xbf16>
    %cst_16 = arith.constant dense<0.000000e+00> : vector<8x512xf32>
    %21 = tpu.matmul %20, %19, %cst_16 {dimension_numbers = #tpu.dot_dimension_numbers<[1], [0], [0], [1], [0, 0, 1, 1], [], []>} : vector<8x64xbf16>, vector<64x512xbf16>, vector<8x512xf32> -> vector<8x512xf32>
    %c0_17 = arith.constant 0 : index
    %c0_18 = arith.constant 0 : index
    %22 = vector.load %arg8[%c0_17, %c0_18] : memref<8x1xf32, #tpu.memory_space<vmem>>, vector<8x1xf32>
    %23 = vector.broadcast %22 : vector<8x1xf32> to vector<8x512xf32>
    %24 = arith.addf %21, %23 : vector<8x512xf32>
    %c0_19 = arith.constant 0 : index
    %c0_20 = arith.constant 0 : index
    %c0_21 = arith.constant 0 : index
    %25 = vector.load %arg9[%c0_19, %c0_20, %c0_21] : memref<1x8x512xf32, #tpu.memory_space<vmem>>, vector<1x8x512xf32>
    %26 = vector.shape_cast %25 : vector<1x8x512xf32> to vector<8x512xf32>
    %27 = vector.shape_cast %24 : vector<8x512xf32> to vector<1x8x512xf32>
    tpu.vector_store %arg9[%c0_19, %c0_20, %c0_21], %27 {strides = array<i32>} : memref<1x8x512xf32, #tpu.memory_space<vmem>>, vector<1x8x512xf32>,
    return
  }
  func.func @transform_0(%arg0: i32, %arg1: i32) -> (i32, i32, i32) {
    %c0_i32 = arith.constant 0 : i32
    %c0_i32_0 = arith.constant 0 : i32
    return %arg0, %c0_i32, %arg1 : i32, i32, i32
  }
  func.func @transform_1(%arg0: i32, %arg1: i32) -> (i32, i32, i32) {
    %c0_i32 = arith.constant 0 : i32
    %c0_i32_0 = arith.constant 0 : i32
    %c0_i32_1 = arith.constant 0 : i32
    return %arg0, %c0_i32, %c0_i32_0 : i32, i32, i32
  }
  func.func @transform_2(%arg0: i32, %arg1: i32) -> (i32, i32) {
    %c0_i32 = arith.constant 0 : i32
    %c0_i32_0 = arith.constant 0 : i32
    %c0_i32_1 = arith.constant 0 : i32
    return %c0_i32, %c0_i32_0 : i32, i32
  }
  func.func @transform_3(%arg0: i32, %arg1: i32) -> (i32, i32) {
    %c0_i32 = arith.constant 0 : i32
    %c0_i32_0 = arith.constant 0 : i32
    %c0_i32_1 = arith.constant 0 : i32
    return %c0_i32, %c0_i32_0 : i32, i32
  }
  func.func @transform_4(%arg0: i32, %arg1: i32) -> (i32, i32) {
    %c0_i32 = arith.constant 0 : i32
    %c0_i32_0 = arith.constant 0 : i32
    %c0_i32_1 = arith.constant 0 : i32
    return %c0_i32, %c0_i32_0 : i32, i32
  }
  func.func @transform_5(%arg0: i32, %arg1: i32) -> (i32, i32) {
    %c0_i32 = arith.constant 0 : i32
    %c0_i32_0 = arith.constant 0 : i32
    %c0_i32_1 = arith.constant 0 : i32
    return %c0_i32, %c0_i32_0 : i32, i32
  }
  func.func @transform_6(%arg0: i32, %arg1: i32) -> (i32, i32) {
    %c0_i32 = arith.constant 0 : i32
    %c0_i32_0 = arith.constant 0 : i32
    %c0_i32_1 = arith.constant 0 : i32
    return %c0_i32, %c0_i32_0 : i32, i32
  }
  func.func @transform_7(%arg0: i32, %arg1: i32) -> (i32, i32, i32) {
    %c0_i32 = arith.constant 0 : i32
    %c0_i32_0 = arith.constant 0 : i32
    return %arg0, %c0_i32, %arg1 : i32, i32, i32
  }
}

</mosaic_0001>

<bundles_post_ra>
// kernel: tpu_custom_call.1
= control target key start
LH: loop header
LB: loop body
LE: loop exit
PB: predicated region body
PF: predicated region fallthrough
CT: control target
= control target key end

     0   :  { %12 = vsyncpa [#allocation3], 0  ;;  %s2226_s0 = inlined_call_operand.hbm [shape: f32[2,64,500], index: 0, kind: input, shape index: {}]   ;;  %s2227_s1 = inlined_call_operand.vmem [shape: f32[2,128,1], index: 1, kind: input, shape index: {}]   ;;  %s2228_s2 = inlined_call_operand.vmem [shape: bf16[128,64], index: 2, kind: input, shape index: {}]   ;;  %s2229_s3 = inlined_call_operand.vmem [shape: bf16[64,128], index: 3, kind: input, shape index: {}]   ;;  %s2230_s4 = inlined_call_operand.vmem [shape: f32[64,1], index: 4, kind: input, shape index: {}]   ;;  %s2231_s5 = inlined_call_operand.vmem [shape: bf16[8,64], index: 5, kind: input, shape index: {}]   ;;  %s2232_s6 = inlined_call_operand.vmem [shape: f32[8,1], index: 6, kind: input, shape index: {}]   ;;  %s2233_s7 = inlined_call_operand.hbm [shape: f32[2,8,500], index: 7, kind: output, shape index: {}]  }
   0x1   :  { %14 = vsyncpa [#allocation3 + $0x1], 0 }
   0x2   :  { %15 = vsyncpa [#allocation4], 0 }
   0x3   :  { %17 = vsyncpa [#allocation4 + $0x1], 0  ;;  %s1652_s24 = smov 0   ;;  %s1654_s25 = smov 0  }
   0x4   :  { %s1656_s26 = smov 0   ;;  %s1658_s27 = smov 0  }
   0x5   :  { %s1660_s28 = smov 0   ;;  %s1662_s29 = smov 0  }
   0x6 LB: > { %s1368_s30 = sadd.s32 4294967295, %s1605_s29   ;;  %s1369_s8 = sadd.s32 4294967294, %s1605_s29   ;;  %s1605_s29 = sphi %s1662_s29, %s23_s29   ;;  %s1601_s28 = sphi %s1660_s28, %s2292_s28   ;;  %s1597_s27 = sphi %s1658_s27, %s2291_s27   ;;  %s1593_s26 = sphi %s1656_s26, %s2290_s26   ;;  %s1589_s25 = sphi %s1654_s25, %s2289_s25   ;;  %s1585_s24 = sphi %s1652_s24, %s2288_s24  }
   0x7   : > { %s35_s9 = sadd.s32 1, %s1601_s28  ;;  %s44_s10 = sadd.s32 1, %s1593_s26 }
   0x8   : > { %p37_p0 = scmp.ge.s32.totalorder %s35_s9, 2  ;;  %p51_p1 = scmp.ne.s32.totalorder %s1593_s26, %s1589_s25 }
   0x9   : > { %p52_p2 = scmp.eq.s32.totalorder %s1605_s29, 0  ;;  %p57_p3 = scmp.ne.s32.totalorder %s1589_s25, %s1585_s24 }
   0xa   : > { %s2294_s9 = smov (%p37_p0, %s35_s9), 0  ;;  %p58_p5 = scmp.eq.s32.totalorder %s1368_s30, 0 }
   0xb   : > { %2239 = sst [smem:[#allocation8_spill]] %s2294_s9  ;;  %p1693_p4 = por %p52_p2, %p51_p1 }
   0xc   : > { %s39_s12 = ssub.s32 %s1601_s28, %s2294_s9  ;;  %p214_p6 = scmp.eq.s32.totalorder %s1368_s30, 1 }
   0xd   : > { %p42_p7 = scmp.eq.s32.totalorder %s39_s12, 0  ;;  %p1699_p8 = por %p58_p5, %p57_p3 }
   0xe   : > { %p1703_p9 = por %p214_p6, %p51_p1  ;;  %p220_p10 = scmp.eq.s32.totalorder %s1369_s8, 1 }
   0xf   : > { %s1708_s15 = scalar_select %p42_p7, %s1593_s26, %s44_s10  }
  0x10   : > { %p1710_p11 = por %p220_p10, %p57_p3  ;;  %p1430_p13 = scmp.lt.s32.totalorder %s1605_s29, 2 }
  0x11   : > { %s255_s17 = sand.u32 1, %s1593_s26   ;;  %s1415_s19 = sshll.u32 %s1601_s28, 12 }
  0x12   : > { %s1372_s18 = sshll.u32 %s255_s17, 8  ;;  %s267_s22 = scalar_lea.hbm %s2226_s0, %s1415_s19 }
  0x13   : > { %s259_s23 = scalar_lea.vmem [#allocation2], %s1372_s18  ;;  %p1723_p0 = pnand %p1430_p13, %p1693_p4 }
  0x14   : > { %s268_s30 = sshll.u32 %s259_s23, 4  ;;  %p1375_p1 = scmp.ge.s32.totalorder %s1605_s29, 1  ;;  %s269_s30 = int_to_ptr.vmem [resolvable:$true] %s268_s30 }
  0x15   : > { %s256_s10 = scalar_lea.sflag [#allocation3], %s255_s17  ;;  %p1499_p2 = pneg %p1723_p0 }
  0x16   : > { %s1510_s12 = scalar_lea.vmem %s269_s30, 4096  ;;  %s1607_s9 = smov [#allocation2]  }
  0x17   : > { %p1511_p3 = scmp.ne.s32.totalorder %s269_s30, %s1510_s12  ;;  %s1515_s20 = sshll.u32 %s1607_s9, 4  ;;  %s1516_s20 = int_to_ptr.vmem [resolvable:$false] %s1515_s20 }
  0x18   : > { %s1517_s18 = scalar_lea.vmem %s1516_s20, 8192  ;;  %p1518_p7 = scmp.lt.s32.totalorder %s269_s30, %s1516_s20 }
  0x19   : > { %p1513_p5 = pnand %p1511_p3, %p1499_p2  ;;  %p1519_p10 = scmp.lt.s32.totalorder %s1517_s18, %s1510_s12 }
  0x1b   : > { %p1514_p6 = pneg %p1513_p5  ;;  %p1520_p12 = por %p1519_p10, %p1518_p7 }
  0x1d   : > { %p1521_p4 = pnand %p1520_p12, %p1514_p6 }
  0x1f   : > { %1524 = shalt.err (!%p1521_p4)
}
  0x20   : > { %s1608_s11 = smov 512   ;;  %s1609_s17 = smov 32  }
  0x21   : > { %1425 = dma.hbm_to_vmem [thread:$0]  (!%p1723_p0), %s267_s22, 4096, %s269_s30, %s256_s10, %s1608_s11, %s1608_s11, %s1609_s17  }
  0x22   : > { %p284_p13 = scmp.lt.s32.totalorder %s1605_s29, 3 }
  0x24   : > { %p285_p2 = pnand %p1375_p1, %p284_p13 }
  0x26   : > { %288 = sbr.rel (%p285_p2) target bundleno = 817 (0x331), region = 48 }
  0x2b   : > { %s1736_s9 = sand.u32 1, %s1589_s25  }
  0x2c   : > { %s1376_s19 = sshll.u32 %s1736_s9, 8  ;;  %s291_s21 = scalar_lea.sflag [#allocation3], %s1736_s9 }
  0x2d   : > { %s1740_s23 = scalar_lea.vmem [#allocation2], %s1376_s19 }
  0x2e   : > { %1576 = dma.done.wait (%p1699_p8), %s291_s21, 4096  }
  0x2f   : > { %1578 = vsyncadd (%p1699_p8), %s291_s21, 4294963200  ;;  %v2235_v0 = vmov 0   ;;  %v363_v1 = vld [vmem:[%s1740_s23 + $0xc8] sm:$0xff]  ;;  %v365_v3 = vld [vmem:[%s1740_s23 + $0xd8] sm:$0xff]  ;;  %p331_p8 = scmp.lt.s32.totalorder %s1597_s27, 1  ;;  %vm538_vm0 = vcmask 523264  }
  0x30   : > { %595 = vmatprep.mubr.bf16.mxu0 %v2235_v0  ;;  %708 = vmatprep.mubr.bf16.mxu1 %v2235_v0  ;;  %v367_v2 = vld [vmem:[%s1740_s23 + $0xe8] sm:$0xff]  ;;  %v369_v5 = vld [vmem:[%s1740_s23 + $0xf8] sm:$0xff]  ;;  %v362_v6 = vld [vmem:[%s1740_s23 + $0xc0] sm:$0xff]  ;;  %s1377_s19 = sshll.u32 %s1736_s9, 5  ;;  %s1417_s21 = sshll.u32 %s1597_s27, 9 }
  0x31   : > { %1483 = vset.pattern.permute.xlu0 %v2235_v0  ;;  %1484 = vset.pattern.permute.xlu1 %v2235_v0  ;;  %v383_v4 = vpack.c.bf16 %v367_v2, %v363_v1  ;;  %v366_v7 = vld [vmem:[%s1740_s23 + $0xe0] sm:$0xff]  ;;  %v385_v8 = vpack.c.bf16 %v369_v5, %v365_v3  ;;  %v364_v10 = vld [vmem:[%s1740_s23 + $0xd0] sm:$0xff]  ;;  %v355_v12 = vld [vmem:[%s1740_s23 + $0x88] sm:$0xff]  ;;  %s332_s13 = scalar_select %p331_p8, %s1597_s27, 1 }
  0x32   : > { %v382_v9 = vpack.c.bf16 %v366_v7, %v362_v6  ;;  %v368_v11 = vld [vmem:[%s1740_s23 + $0xf0] sm:$0xff]  ;;  %v359_v14 = vld [vmem:[%s1740_s23 + $0xa8] sm:$0xff]  ;;  %v357_v15 = vld [vmem:[%s1740_s23 + $0x98] sm:$0xff]  ;;  %s2178_s8 = scalar_lea.hbm %s2233_s7, %s1417_s21  ;;  %s1256_s27 = scalar_lea.sflag [#allocation4], %s1736_s9 }
  0x33   : > { %571 = vmatprep.subr.bf16.mxu0 %v383_v4  ;;  %v384_v13 = vpack.c.bf16 %v368_v11, %v364_v10  ;;  %v361_v16 = vld [vmem:[%s1740_s23 + $0xb8] sm:$0xff]  ;;  %684 = vmatprep.subr.bf16.mxu1 %v385_v8  ;;  %v379_v17 = vpack.c.bf16 %v359_v14, %v355_v12  ;;  %v354_v19 = vld [vmem:[%s1740_s23 + $0x80] sm:$0xff]  ;;  %v356_v21 = vld [vmem:[%s1740_s23 + $0x90] sm:$0xff]  ;;  %s1416_s22 = sshll.u32 %s332_s13, 7  ;;  %s1611_s20 = smov [#allocation5]  }
  0x34   : > { %572 = vmatpush1.bf16.msra.mxu0 %v382_v9  ;;  %v381_v18 = vpack.c.bf16 %v361_v16, %v357_v15  ;;  %v358_v20 = vld [vmem:[%s1740_s23 + $0xa0] sm:$0xff]  ;;  %v360_v23 = vld [vmem:[%s1740_s23 + $0xb0] sm:$0xff]  ;;  %v347_v24 = vld [vmem:[%s1740_s23 + $0x48] sm:$0xff]  ;;  %s1789_s10 = scalar_lea.vmem %s2227_s1, %s1416_s22 }
  0x35   : > { %685 = vmatpush1.bf16.msra.mxu1 %v384_v13  ;;  %v378_v22 = vpack.c.bf16 %v358_v20, %v354_v19  ;;  %v351_v25 = vld [vmem:[%s1740_s23 + $0x68] sm:$0xff]  ;;  %573 = vmatprep.subr.bf16.mxu0 %v379_v17  ;;  %v380_v26 = vpack.c.bf16 %v360_v23, %v356_v21  ;;  %v349_v28 = vld [vmem:[%s1740_s23 + $0x58] sm:$0xff]  ;;  %v346_v30 = vld [vmem:[%s1740_s23 + $0x40] sm:$0xff] }
  0x36   : > { %686 = vmatprep.subr.bf16.mxu1 %v381_v18  ;;  %v375_v27 = vpack.c.bf16 %v351_v25, %v347_v24  ;;  %v353_v29 = vld [vmem:[%s1740_s23 + $0x78] sm:$0xff]  ;;  %v350_v32 = vld [vmem:[%s1740_s23 + $0x60] sm:$0xff]  ;;  %v348_v33 = vld [vmem:[%s1740_s23 + $0x50] sm:$0xff] }
  0x37   : > { %v377_v31 = vpack.c.bf16 %v353_v29, %v349_v28  ;;  %v352_v34 = vld [vmem:[%s1740_s23 + $0x70] sm:$0xff]  ;;  %v374_v35 = vpack.c.bf16 %v350_v32, %v346_v30  ;;  %v339_v36 = vld [vmem:[%s1740_s23 + $0x8] sm:$0xff]  ;;  %v341_v38 = vld [vmem:[%s1740_s23 + $0x18] sm:$0xff] }
  0x38   : > { %574 = vmatpush1.bf16.msra.mxu0 %v378_v22  ;;  %v343_v37 = vld [vmem:[%s1740_s23 + $0x28] sm:$0xff]  ;;  %v376_v39 = vpack.c.bf16 %v352_v34, %v348_v33  ;;  %v345_v41 = vld [vmem:[%s1740_s23 + $0x38] sm:$0xff]  ;;  %v338_v42 = vld [vmem:[%s1740_s23] sm:$0xff] }
  0x39   : > { %687 = vmatpush1.bf16.msra.mxu1 %v380_v26  ;;  %575 = vmatprep.subr.bf16.mxu0 %v375_v27  ;;  %v371_v40 = vpack.c.bf16 %v343_v37, %v339_v36  ;;  %v342_v43 = vld [vmem:[%s1740_s23 + $0x20] sm:$0xff]  ;;  %v373_v44 = vpack.c.bf16 %v345_v41, %v341_v38  ;;  %v340_v45 = vld [vmem:[%s1740_s23 + $0x10] sm:$0xff]  ;;  %v417_v52 = vld [vmem:[%s1789_s10 + $0x78] sm:$0xff] }
  0x3a   : > { %688 = vmatprep.subr.bf16.mxu1 %v377_v31  ;;  %v344_v46 = vld [vmem:[%s1740_s23 + $0x30] sm:$0xff]  ;;  %v370_v47 = vpack.c.bf16 %v342_v43, %v338_v42  ;;  %v1485_v49 = vld [vmem:[%s2228_s2] sm:$0xff]   ;;  %v415_v53 = vld [vmem:[%s1789_s10 + $0x68] sm:$0xff]  ;;  %s329_s23 = scalar_lea.vmem [#allocation5], %s1377_s19 }
  0x3b   : > { %v372_v48 = vpack.c.bf16 %v344_v46, %v340_v45  ;;  %v416_v50 = vld [vmem:[%s1789_s10 + $0x70] sm:$0xff]  ;;  %v414_v51 = vld [vmem:[%s1789_s10 + $0x60] sm:$0xff]  ;;  %v1486_v55 = vld [vmem:[%s2228_s2 + $0x8] sm:$0xff]   ;;  %s1272_s13 = sshll.u32 %s329_s23, 4  ;;  %s2180_s13 = int_to_ptr.vmem [resolvable:$true] %s1272_s13 }
  0x3c   : > { %576 = vmatpush1.bf16.msra.mxu0 %v374_v35  ;;  %490 = vperm.xlu0 %1483, %v416_v50   ;;  %v412_v54 = vld [vmem:[%s1789_s10 + $0x50] sm:$0xff]  ;;  %v413_v56 = vld [vmem:[%s1789_s10 + $0x58] sm:$0xff]  ;;  %v410_v57 = vld [vmem:[%s1789_s10 + $0x40] sm:$0xff]  ;;  %s1525_s12 = scalar_lea.vmem %s2180_s13, 512 }
  0x3d   : > { %689 = vmatpush1.bf16.msra.mxu1 %v376_v39  ;;  %577 = vmatprep.subr.bf16.mxu0 %v371_v40  ;;  %v411_v58 = vld [vmem:[%s1789_s10 + $0x48] sm:$0xff]  ;;  %v408_v59 = vld [vmem:[%s1789_s10 + $0x30] sm:$0xff]  ;;  %v409_v61 = vld [vmem:[%s1789_s10 + $0x38] sm:$0xff]  ;;  %p1526_p12 = scmp.ne.s32.totalorder %s2180_s13, %s1525_s12 }
  0x3e   : > { %690 = vmatprep.subr.bf16.mxu1 %v373_v44  ;;  %480 = vperm.xlu1 %1484, %v414_v51   ;;  %v1487_v60 = vld [vmem:[%s2228_s2 + $0x10] sm:$0xff]   ;;  %v406_v62 = vld [vmem:[%s1789_s10 + $0x20] sm:$0xff]  ;;  %v407_v63 = vld [vmem:[%s1789_s10 + $0x28] sm:$0xff] }
  0x3f   : > { %v404_v1 = vld [vmem:[%s1789_s10 + $0x10] sm:$0xff]  ;;  %v1488_v2 = vld [vmem:[%s2228_s2 + $0x18] sm:$0xff]   ;;  %v402_v4 = vld [vmem:[%s1789_s10] sm:$0xff]  ;;  %p1527_p0 = pnand %p1526_p12, %p1703_p9 }
  0x40   : > { %578 = vmatpush1.bf16.msra.mxu0 %v370_v47  ;;  %495 = vperm.xlu0 %1483, %v417_v52   ;;  %v405_v3 = vld [vmem:[%s1789_s10 + $0x18] sm:$0xff]  ;;  %v403_v5 = vld [vmem:[%s1789_s10 + $0x8] sm:$0xff]  ;;  %v899_v6 = vld [vmem:[%s2230_s4 + $0x30] sm:$0xff]  ;;  %s1529_s10 = sshll.u32 %s1611_s20, 4  ;;  %s1530_s10 = int_to_ptr.vmem [resolvable:$false] %s1529_s10 }
  0x41   : > { %691 = vmatpush1.bf16.msra.mxu1 %v372_v48  ;;  %v1489_v7 = vld [vmem:[%s2228_s2 + $0x20] sm:$0xff]   ;;  %v900_v8 = vld [vmem:[%s2230_s4 + $0x38] sm:$0xff]  ;;  %v898_v10 = vld [vmem:[%s2230_s4 + $0x28] sm:$0xff]  ;;  %p1528_p1 = pneg %p1527_p0  ;;  %s1531_s18 = scalar_lea.vmem %s1530_s10, 1024 }
  0x42   : > { %485 = vperm.xlu1 %1484, %v415_v53   ;;  %v897_v9 = vld [vmem:[%s2230_s4 + $0x20] sm:$0xff]  ;;  %v895_v11 = vld [vmem:[%s2230_s4 + $0x10] sm:$0xff]  ;;  %v1490_v12 = vld [vmem:[%s2228_s2 + $0x28] sm:$0xff]   ;;  %p1532_p3 = scmp.lt.s32.totalorder %s2180_s13, %s1530_s10  ;;  %p1533_p5 = scmp.lt.s32.totalorder %s1531_s18, %s1525_s12 }
  0x43   : > { %1388 = vmatmul.mubr.msk.bf16.vlgmr.msra.gmra.mxu0 %vm538_vm0, %v1485_v49  ;;  %v896_v13 = vld [vmem:[%s2230_s4 + $0x18] sm:$0xff]  ;;  %v893_v14 = vld [vmem:[%s2230_s4] sm:$0xff]  ;;  %v894_v15 = vld [vmem:[%s2230_s4 + $0x8] sm:$0xff] }
  0x44   : > { %1396 = vmatmul.mubr.msk.bf16.vlgmr.msra.gmra.mxu1 %vm538_vm0, %v1485_v49  ;;  %605 = vmatprep.mubr.bf16.mxu0 %v2235_v0  ;;  %v1160_v16 = vld [vmem:[%s2232_s6] sm:$0xff]  ;;  %v1491_v17 = vld [vmem:[%s2228_s2 + $0x30] sm:$0xff]   ;;  %v1492_v18 = vld [vmem:[%s2228_s2 + $0x38] sm:$0xff]   ;;  %p1534_p6 = por %p1533_p5, %p1532_p3 }
  0x45   : > { %718 = vmatprep.mubr.bf16.mxu1 %v2235_v0  ;;  %470 = vperm.xlu0 %1483, %v412_v54  }
  0x46   : > { %475 = vperm.xlu1 %1484, %v413_v56   ;;  %p1535_p7 = pnand %p1534_p6, %p1528_p1 }
  0x49   : > { %460 = vperm.xlu0 %1483, %v410_v57  }
  0x4a   : > { %465 = vperm.xlu1 %1484, %v411_v58  }
  0x4b   : > { %1389 = vmatmul.mubr.msk.bf16.gmra.mxu0 %vm538_vm0, %v1486_v55 }
  0x4c   : > { %1397 = vmatmul.mubr.msk.bf16.gmra.mxu1 %vm538_vm0, %v1486_v55  ;;  %615 = vmatprep.mubr.bf16.mxu0 %v2235_v0 }
  0x4d   : > { %728 = vmatprep.mubr.bf16.mxu1 %v2235_v0  ;;  %450 = vperm.xlu0 %1483, %v408_v59  }
  0x4e   : > { %455 = vperm.xlu1 %1484, %v409_v61  }
  0x51   : > { %440 = vperm.xlu0 %1483, %v406_v62  }
  0x52   : > { %445 = vperm.xlu1 %1484, %v407_v63  }
  0x53   : > { %1390 = vmatmul.mubr.msk.bf16.gmra.mxu0 %vm538_vm0, %v1487_v60 }
  0x54   : > { %1398 = vmatmul.mubr.msk.bf16.gmra.mxu1 %vm538_vm0, %v1487_v60  ;;  %625 = vmatprep.mubr.bf16.mxu0 %v2235_v0 }
  0x55   : > { %738 = vmatprep.mubr.bf16.mxu1 %v2235_v0  ;;  %430 = vperm.xlu0 %1483, %v404_v1  }
  0x56   : > { %435 = vperm.xlu1 %1484, %v405_v3  }
  0x59   : > { %420 = vperm.xlu0 %1483, %v402_v4  }
  0x5a   : > { %425 = vperm.xlu1 %1484, %v403_v5  }
  0x5b   : > { %1391 = vmatmul.mubr.msk.bf16.gmra.mxu0 %vm538_vm0, %v1488_v2 }
  0x5c   : > { %1399 = vmatmul.mubr.msk.bf16.gmra.mxu1 %vm538_vm0, %v1488_v2  ;;  %635 = vmatprep.mubr.bf16.mxu0 %v2235_v0 }
  0x5d   : > { %748 = vmatprep.mubr.bf16.mxu1 %v2235_v0  ;;  %933 = vperm.xlu0 %1483, %v899_v6  }
  0x5e   : > { %938 = vperm.xlu1 %1484, %v900_v8  }
  0x61   : > { %923 = vperm.xlu0 %1483, %v897_v9  }
  0x62   : > { %928 = vperm.xlu1 %1484, %v898_v10  }
  0x63   : > { %1392 = vmatmul.mubr.msk.bf16.gmra.mxu0 %vm538_vm0, %v1489_v7 }
  0x64   : > { %1400 = vmatmul.mubr.msk.bf16.gmra.mxu1 %vm538_vm0, %v1489_v7  ;;  %645 = vmatprep.mubr.bf16.mxu0 %v2235_v0 }
  0x65   : > { %758 = vmatprep.mubr.bf16.mxu1 %v2235_v0  ;;  %913 = vperm.xlu0 %1483, %v895_v11  }
  0x66   : > { %918 = vperm.xlu1 %1484, %v896_v13  }
  0x69   : > { %903 = vperm.xlu0 %1483, %v893_v14  }
  0x6a   : > { %908 = vperm.xlu1 %1484, %v894_v15  }
  0x6b   : > { %1393 = vmatmul.mubr.msk.bf16.gmra.mxu0 %vm538_vm0, %v1490_v12 }
  0x6c   : > { %1401 = vmatmul.mubr.msk.bf16.gmra.mxu1 %vm538_vm0, %v1490_v12  ;;  %655 = vmatprep.mubr.bf16.mxu0 %v2235_v0 }
  0x6d   : > { %768 = vmatprep.mubr.bf16.mxu1 %v2235_v0  ;;  %1163 = vperm.xlu0 %1483, %v1160_v16  }
  0x73   : > { %1394 = vmatmul.mubr.msk.bf16.gmra.mxu0 %vm538_vm0, %v1491_v17 }
  0x74   : > { %1402 = vmatmul.mubr.msk.bf16.gmra.mxu1 %vm538_vm0, %v1491_v17  ;;  %665 = vmatprep.mubr.bf16.mxu0 %v2235_v0 }
  0x75   : > { %778 = vmatprep.mubr.bf16.mxu1 %v2235_v0 }
  0x7b   : > { %1395 = vmatmul.mubr.msk.bf16.gmra.mxu0 %vm538_vm0, %v1492_v18 }
  0x7c   : > { %1403 = vmatmul.mubr.msk.bf16.gmra.mxu1 %vm538_vm0, %v1492_v18  ;;  %997 = vmatprep.mubr.bf16.mxu0 %v2235_v0 }
  0x7d   : > { %1070 = vmatprep.mubr.bf16.mxu1 %v2235_v0 }
  0xb7   : > { %v1890_v19 = vpop.permute.xlu0 %490 }
  0xb9   : > { %v1892_v20 = vpop.permute.xlu1 %480 }
  0xbb   : > { %v1894_v21 = vpop.permute.xlu0 %495 }
  0xbd   : > { %v1896_v22 = vpop.permute.xlu1 %485 }
  0xc0   : > { %v1898_v23 = vpop.permute.xlu0 %470 }
  0xc1   : > { %v1900_v24 = vpop.permute.xlu1 %475 }
  0xc4   : > { %v1902_v25 = vpop.permute.xlu0 %460 }
  0xc5   : > { %v1904_v26 = vpop.permute.xlu1 %465 }
  0xc8   : > { %v1906_v27 = vpop.permute.xlu0 %450 }
  0xc9   : > { %v1908_v28 = vpop.permute.xlu1 %455 }
  0xcc   : > { %v1910_v29 = vpop.permute.xlu0 %440 }
  0xcd   : > { %2245 = vst [vmem:[#allocation9_spill] sm:$0xff] %v1910_v29  ;;  %v1912_v30 = vpop.permute.xlu1 %445 }
  0xd0   : > { %v431_v31 = vpop.permute.xlu0 %430 }
  0xd1   : > { %v436_v32 = vpop.permute.xlu1 %435 }
  0xd4   : > { %v421_v33 = vpop.permute.xlu0 %420 }
  0xd5   : > { %v426_v37 = vpop.permute.xlu1 %425 }
 0x103   : > { %v597_v34 = vpop.f32.mrf.mxu0 }
 0x104   : > { %v710_v35 = vpop.f32.mrf.mxu1  ;;  %v598_v38 = vadd.f32 %v597_v34, %v421_v33 }
 0x105   : > { %v599_v36 = vpop.f32.mrf.mxu0  ;;  %v711_v40 = vadd.f32 %v710_v35, %v421_v33 }
 0x106   : > { %v712_v39 = vpop.f32.mrf.mxu1  ;;  %v600_v42 = vadd.f32 %v599_v36, %v421_v33  ;;  %v789_v48 = vmax.f32 %v598_v38, 0.0 }
 0x107   : > { %v601_v41 = vpop.f32.mrf.mxu0  ;;  %v713_v45 = vadd.f32 %v712_v39, %v421_v33  ;;  %v791_v52 = vmax.f32 %v711_v40, 0.0 }
 0x108   : > { %v602_v43 = vadd.f32 %v601_v41, %v426_v37  ;;  %v714_v44 = vpop.f32.mrf.mxu1  ;;  %v790_v56 = vmax.f32 %v600_v42, 0.0 }
 0x109   : > { %v715_v46 = vadd.f32 %v714_v44, %v426_v37  ;;  %v603_v47 = vpop.f32.mrf.mxu0  ;;  %v792_v60 = vmax.f32 %v713_v45, 0.0 }
 0x10a   : > { %v793_v49 = vmax.f32 %v602_v43, 0.0  ;;  %v604_v50 = vadd.f32 %v603_v47, %v426_v37  ;;  %v716_v51 = vpop.f32.mrf.mxu1 }
 0x10b   : > { %v795_v53 = vmax.f32 %v715_v46, 0.0  ;;  %v717_v54 = vadd.f32 %v716_v51, %v426_v37  ;;  %v607_v55 = vpop.f32.mrf.mxu0 }
 0x10c   : > { %v1914_v57 = vpack.c.bf16 %v793_v49, %v789_v48  ;;  %v794_v58 = vmax.f32 %v604_v50, 0.0  ;;  %v720_v59 = vpop.f32.mrf.mxu1  ;;  %v608_v2 = vadd.f32 %v607_v55, %v431_v31 }
 0x10d   : > { %v1916_v61 = vpack.c.bf16 %v795_v53, %v791_v52  ;;  %v796_v62 = vmax.f32 %v717_v54, 0.0  ;;  %v609_v63 = vpop.f32.mrf.mxu0  ;;  %v721_v5 = vadd.f32 %v720_v59, %v431_v31 }
 0x10e   : > { %2246 = vst [vmem:[#allocation10_spill] sm:$0xff] %v1914_v57  ;;  %v1918_v1 = vpack.c.bf16 %v794_v58, %v790_v56  ;;  %v722_v3 = vpop.f32.mrf.mxu1  ;;  %v610_v7 = vadd.f32 %v609_v63, %v431_v31  ;;  %v797_v13 = vmax.f32 %v608_v2, 0.0 }
 0x10f   : > { %2247 = vst [vmem:[#allocation11_spill] sm:$0xff] %v1916_v61  ;;  %v1920_v4 = vpack.c.bf16 %v796_v62, %v792_v60  ;;  %v611_v6 = vpop.f32.mrf.mxu0  ;;  %v723_v10 = vadd.f32 %v722_v3, %v431_v31  ;;  %v799_v17 = vmax.f32 %v721_v5, 0.0 }
 0x110   : > { %2248 = vst [vmem:[#allocation12_spill] sm:$0xff] %v1918_v1  ;;  %v612_v8 = vadd.f32 %v611_v6, %v436_v32  ;;  %v724_v9 = vpop.f32.mrf.mxu1  ;;  %v798_v35 = vmax.f32 %v610_v7, 0.0 }
 0x111   : > { %2249 = vst [vmem:[#allocation13_spill] sm:$0xff] %v1920_v4  ;;  %v725_v11 = vadd.f32 %v724_v9, %v436_v32  ;;  %v613_v12 = vpop.f32.mrf.mxu0  ;;  %v800_v39 = vmax.f32 %v723_v10, 0.0 }
 0x112   : > { %v801_v14 = vmax.f32 %v612_v8, 0.0  ;;  %v614_v15 = vadd.f32 %v613_v12, %v436_v32  ;;  %v726_v16 = vpop.f32.mrf.mxu1 }
 0x113   : > { %v803_v18 = vmax.f32 %v725_v11, 0.0  ;;  %v727_v33 = vadd.f32 %v726_v16, %v436_v32  ;;  %v1922_v34 = vpop.f32.mrf.mxu0 }
 0x114   : > { %2250 = vst [vmem:[#allocation14_spill] sm:$0xff] %v1922_v34  ;;  %v1924_v36 = vpack.c.bf16 %v801_v14, %v797_v13  ;;  %v802_v37 = vmax.f32 %v614_v15, 0.0  ;;  %v1926_v38 = vpop.f32.mrf.mxu1 }
 0x115   : > { %2252 = vst [vmem:[#allocation16_spill] sm:$0xff] %v1926_v38  ;;  %v1928_v40 = vpack.c.bf16 %v803_v18, %v799_v17  ;;  %v804_v31 = vmax.f32 %v727_v33, 0.0  ;;  %v619_v41 = vpop.f32.mrf.mxu0 }
 0x116   : > { %2251 = vst [vmem:[#allocation15_spill] sm:$0xff] %v1924_v36  ;;  %v1930_v42 = vpack.c.bf16 %v802_v37, %v798_v35  ;;  %v732_v43 = vpop.f32.mrf.mxu1  ;;  %v1959_v37 = vadd.f32 %v619_v41, %v1910_v29 }
 0x117   : > { %2253 = vst [vmem:[#allocation17_spill] sm:$0xff] %v1928_v40  ;;  %v1932_v44 = vpack.c.bf16 %v804_v31, %v800_v39  ;;  %v1934_v45 = vpop.f32.mrf.mxu0  ;;  %v1962_v39 = vadd.f32 %v732_v43, %v1910_v29 }
 0x118   : > { %2254 = vst [vmem:[#allocation18_spill] sm:$0xff] %v1930_v42  ;;  %2256 = vst [vmem:[#allocation20_spill] sm:$0xff] %v1934_v45  ;;  %v1936_v32 = vpop.f32.mrf.mxu1 }
 0x119   : > { %2255 = vst [vmem:[#allocation19_spill] sm:$0xff] %v1932_v44  ;;  %2257 = vst [vmem:[#allocation21_spill] sm:$0xff] %v1936_v32  ;;  %v623_v46 = vpop.f32.mrf.mxu0 }
 0x11a   : > { %v736_v47 = vpop.f32.mrf.mxu1  ;;  %2259 = vst [vmem:[#allocation23_spill] sm:$0xff] %v1959_v37  ;;  %2260 = vst [vmem:[#allocation24_spill] sm:$0xff] %v1962_v39  ;;  %v1965_v0 = vadd.f32 %v623_v46, %v1912_v30 }
 0x11b   : > { %v1938_v48 = vpop.f32.mrf.mxu0  ;;  %v1968_v61 = vadd.f32 %v736_v47, %v1912_v30 }
 0x11c   : > { %v1940_v49 = vpop.f32.mrf.mxu1  ;;  %2261 = vst [vmem:[#allocation25_spill] sm:$0xff] %v1965_v0 }
 0x11d   : > { %2258 = vst [vmem:[#allocation22_spill] sm:$0xff] %v1940_v49  ;;  %v629_v50 = vpop.f32.mrf.mxu0  ;;  %2262 = vst [vmem:[#allocation26_spill] sm:$0xff] %v1968_v61 }
 0x11e   : > { %v742_v51 = vpop.f32.mrf.mxu1  ;;  %v1971_v57 = vadd.f32 %v629_v50, %v1906_v27 }
 0x11f   : > { %v1942_v52 = vpop.f32.mrf.mxu0  ;;  %v1974_v4 = vadd.f32 %v742_v51, %v1906_v27 }
 0x120   : > { %v1944_v53 = vpop.f32.mrf.mxu1  ;;  %2263 = vst [vmem:[#allocation27_spill] sm:$0xff] %v1971_v57 }
 0x121   : > { %v633_v54 = vpop.f32.mrf.mxu0  ;;  %2264 = vst [vmem:[#allocation28_spill] sm:$0xff] %v1974_v4 }
 0x122   : > { %v746_v55 = vpop.f32.mrf.mxu1  ;;  %v1977_v41 = vadd.f32 %v633_v54, %v1908_v28 }
 0x123   : > { %v1946_v56 = vpop.f32.mrf.mxu0  ;;  %v1980_v43 = vadd.f32 %v746_v55, %v1908_v28 }
 0x124   : > { %v1948_v58 = vpop.f32.mrf.mxu1 }
 0x125   : > { %v639_v59 = vpop.f32.mrf.mxu0 }
 0x126   : > { %v752_v60 = vpop.f32.mrf.mxu1  ;;  %v1983_v40 = vadd.f32 %v639_v59, %v1902_v25 }
 0x127   : > { %v1950_v62 = vpop.f32.mrf.mxu0  ;;  %v1986_v46 = vadd.f32 %v752_v60, %v1902_v25 }
 0x128   : > { %v1952_v63 = vpop.f32.mrf.mxu1 }
 0x129   : > { %v643_v2 = vpop.f32.mrf.mxu0 }
 0x12a   : > { %v756_v3 = vpop.f32.mrf.mxu1  ;;  %v1989_v50 = vadd.f32 %v643_v2, %v1904_v26 }
 0x12b   : > { %v1954_v5 = vpop.f32.mrf.mxu0  ;;  %v1992_v51 = vadd.f32 %v756_v3, %v1904_v26 }
 0x12c   : > { %v1956_v6 = vpop.f32.mrf.mxu1 }
 0x12d   : > { %v649_v7 = vpop.f32.mrf.mxu0 }
 0x12e   : > { %v762_v8 = vpop.f32.mrf.mxu1  ;;  %v1995_v36 = vadd.f32 %v649_v7, %v1898_v23 }
 0x12f   : > { %v651_v9 = vpop.f32.mrf.mxu0  ;;  %v1998_v54 = vadd.f32 %v762_v8, %v1898_v23 }
 0x130   : > { %v764_v10 = vpop.f32.mrf.mxu1  ;;  %v2001_v59 = vadd.f32 %v651_v9, %v1900_v24 }
 0x131   : > { %v653_v11 = vpop.f32.mrf.mxu0  ;;  %v2004_v60 = vadd.f32 %v764_v10, %v1900_v24 }
 0x132   : > { %v766_v12 = vpop.f32.mrf.mxu1  ;;  %v2007_v44 = vadd.f32 %v653_v11, %v1900_v24 }
 0x133   : > { %v657_v13 = vpop.f32.mrf.mxu0  ;;  %v2010_v2 = vadd.f32 %v766_v12, %v1900_v24 }
 0x134   : > { %v770_v14 = vpop.f32.mrf.mxu1  ;;  %v658_v7 = vadd.f32 %v657_v13, %v1892_v20 }
 0x135   : > { %v659_v15 = vpop.f32.mrf.mxu0 }
 0x136   : > { %v772_v16 = vpop.f32.mrf.mxu1  ;;  %v660_v12 = vadd.f32 %v659_v15, %v1892_v20 }
 0x137   : > { %v661_v17 = vpop.f32.mrf.mxu0  ;;  %v773_v13 = vadd.f32 %v772_v16, %v1892_v20 }
 0x138   : > { %v774_v18 = vpop.f32.mrf.mxu1 }
 0x139   : > { %v663_v33 = vpop.f32.mrf.mxu0  ;;  %v840_v49 = vmax.f32 %v773_v13, 0.0  ;;  %v2267_v13 = vld [vmem:[#allocation27_spill] sm:$0xff] }
 0x13a   : > { %v776_v35 = vpop.f32.mrf.mxu1  ;;  %v664_v42 = vadd.f32 %v663_v33, %v1896_v22 }
 0x13b   : > { %v667_v31 = vpop.f32.mrf.mxu0  ;;  %v777_v37 = vadd.f32 %v776_v35, %v1896_v22  ;;  %v775_v35 = vadd.f32 %v774_v18, %v1896_v22  ;;  %v834_v18 = vmax.f32 %v2007_v44, 0.0 }
 0x13c   : > { %v780_v1 = vpop.f32.mrf.mxu1  ;;  %v668_v10 = vadd.f32 %v667_v31, %v1890_v19 }
 0x13d   : > { %v669_v47 = vpop.f32.mrf.mxu0  ;;  %v781_v33 = vadd.f32 %v780_v1, %v1890_v19  ;;  %v844_v4 = vmax.f32 %v777_v37, 0.0  ;;  %v838_v1 = vmax.f32 %v660_v12, 0.0  ;;  %v836_v37 = vmax.f32 %v2010_v2, 0.0 }
 0x13e   : > { %v782_v55 = vpop.f32.mrf.mxu1  ;;  %v670_v8 = vadd.f32 %v669_v47, %v1890_v19  ;;  %v845_v15 = vmax.f32 %v668_v10, 0.0 }
 0x13f   : > { %v671_v3 = vpop.f32.mrf.mxu0  ;;  %v783_v11 = vadd.f32 %v782_v55, %v1890_v19  ;;  %v842_v55 = vmax.f32 %v664_v42, 0.0  ;;  %v771_v19 = vadd.f32 %v770_v14, %v1892_v20  ;;  %v880_v20 = vpack.c.bf16 %v844_v4, %v840_v49 }
 0x140   : > { %v672_v39 = vadd.f32 %v671_v3, %v1894_v21  ;;  %v784_v9 = vpop.f32.mrf.mxu1  ;;  %v662_v3 = vadd.f32 %v661_v17, %v1896_v22  ;;  %v846_v29 = vmax.f32 %v670_v8, 0.0  ;;  %v833_v4 = vmax.f32 %v2001_v59, 0.0 }
 0x141   : > { %v785_v38 = vadd.f32 %v784_v9, %v1894_v21  ;;  %v673_v24 = vpop.f32.mrf.mxu0  ;;  %v848_v32 = vmax.f32 %v783_v11, 0.0  ;;  %v839_v44 = vmax.f32 %v771_v19, 0.0  ;;  %v745_v59 = vadd.f32 %v1944_v53, %v1908_v28 }
 0x142   : > { %v674_v47 = vadd.f32 %v673_v24, %v1894_v21  ;;  %v786_v61 = vpop.f32.mrf.mxu1  ;;  %v849_v34 = vmax.f32 %v672_v39, 0.0  ;;  %v847_v24 = vmax.f32 %v781_v33, 0.0  ;;  %v841_v17 = vmax.f32 %v662_v3, 0.0 }
 0x143   : > { %v787_v31 = vadd.f32 %v786_v61, %v1894_v21  ;;  %v851_v9 = vmax.f32 %v785_v38, 0.0  ;;  %v843_v21 = vmax.f32 %v775_v35, 0.0  ;;  %v878_v61 = vpack.c.bf16 %v842_v55, %v838_v1  ;;  %v2270_v55 = vld [vmem:[#allocation25_spill] sm:$0xff] }
 0x144   : > { %v850_v0 = vmax.f32 %v674_v47, 0.0  ;;  %v881_v45 = vpack.c.bf16 %v849_v34, %v845_v15  ;;  %v648_v38 = vadd.f32 %v1954_v5, %v1898_v23  ;;  %v837_v39 = vmax.f32 %v658_v7, 0.0  ;;  %v2268_v47 = vld [vmem:[#allocation21_spill] sm:$0xff] }
 0x145   : > { %v852_v16 = vmax.f32 %v787_v31, 0.0  ;;  %v883_v42 = vpack.c.bf16 %v851_v9, %v847_v24  ;;  %v830_v34 = vmax.f32 %v1995_v36, 0.0  ;;  %v638_v36 = vadd.f32 %v1946_v56, %v1902_v25  ;;  %v2271_v1 = vld [vmem:[#allocation9_spill] sm:$0xff] }
 0x146   : > { %v882_v57 = vpack.c.bf16 %v850_v0, %v846_v29  ;;  %v642_v0 = vadd.f32 %v1950_v62, %v1904_v26  ;;  %v761_v29 = vadd.f32 %v1956_v6, %v1898_v23  ;;  %v877_v49 = vpack.c.bf16 %v841_v17, %v837_v39  ;;  %v2273_v17 = vld [vmem:[#allocation26_spill] sm:$0xff]  ;;  %v2276_v39 = vld [vmem:[#allocation24_spill] sm:$0xff] }
 0x147   : > { %v884_v22 = vpack.c.bf16 %v852_v16, %v848_v32  ;;  %v832_v32 = vmax.f32 %v1998_v54, 0.0  ;;  %v835_v62 = vmax.f32 %v2004_v60, 0.0  ;;  %v874_v5 = vpack.c.bf16 %v834_v18, %v830_v34 }
 0x148   : > { %965 = vmatprep.subr.bf16.mxu0 %v882_v57  ;;  %v755_v57 = vadd.f32 %v1952_v63, %v1904_v26  ;;  %v879_v23 = vpack.c.bf16 %v843_v21, %v839_v44  ;;  %v828_v6 = vmax.f32 %v1992_v51, 0.0  ;;  %v829_v14 = vmax.f32 %v648_v38, 0.0 }
 0x149   : > { %1038 = vmatprep.subr.bf16.mxu1 %v884_v22  ;;  %966 = vmatpush1.bf16.msra.mxu0 %v881_v45  ;;  %v826_v45 = vmax.f32 %v1989_v50, 0.0  ;;  %v876_v2 = vpack.c.bf16 %v836_v37, %v832_v32  ;;  %v632_v26 = vadd.f32 %v1942_v52, %v1908_v28  ;;  %v751_v63 = vadd.f32 %v1948_v58, %v1902_v25  ;;  %v2265_v28 = vld [vmem:[#allocation20_spill] sm:$0xff] }
 0x14a   : > { %1039 = vmatpush1.bf16.msra.mxu1 %v883_v42  ;;  %967 = vmatprep.subr.bf16.mxu0 %v878_v61  ;;  %v822_v50 = vmax.f32 %v1983_v40, 0.0  ;;  %v831_v54 = vmax.f32 %v761_v29, 0.0  ;;  %v824_v56 = vmax.f32 %v1986_v46, 0.0  ;;  %v825_v51 = vmax.f32 %v642_v0, 0.0  ;;  %v2266_v46 = vld [vmem:[#allocation22_spill] sm:$0xff]  ;;  %v2275_v42 = vld [vmem:[#allocation23_spill] sm:$0xff] }
 0x14b   : > { %1040 = vmatprep.subr.bf16.mxu1 %v880_v20  ;;  %v873_v60 = vpack.c.bf16 %v833_v4, %v829_v14  ;;  %v818_v7 = vmax.f32 %v1977_v41, 0.0  ;;  %v827_v8 = vmax.f32 %v755_v57, 0.0  ;;  %v628_v25 = vadd.f32 %v1938_v48, %v1906_v27  ;;  %v2269_v48 = vld [vmem:[#allocation28_spill] sm:$0xff] }
 0x14c   : > { %v870_v52 = vpack.c.bf16 %v826_v45, %v822_v50  ;;  %v875_v10 = vpack.c.bf16 %v835_v62, %v831_v54  ;;  %v820_v40 = vmax.f32 %v1980_v43, 0.0  ;;  %v821_v58 = vmax.f32 %v638_v36, 0.0  ;;  %v2279_v36 = vld [vmem:[#allocation15_spill] sm:$0xff]  ;;  %v2281_v14 = vld [vmem:[#allocation12_spill] sm:$0xff] }
 0x14d   : > { %968 = vmatpush1.bf16.msra.mxu0 %v877_v49  ;;  %v872_v11 = vpack.c.bf16 %v828_v6, %v824_v56  ;;  %v622_v53 = vadd.f32 %v2265_v28, %v1912_v30  ;;  %v741_v12 = vadd.f32 %v2266_v46, %v1906_v27  ;;  %v814_v33 = vmax.f32 %v2267_v13, 0.0  ;;  %v2272_v27 = vld [vmem:[#allocation14_spill] sm:$0xff]  ;;  %v2280_v6 = vld [vmem:[#allocation17_spill] sm:$0xff]  ;;  %v2284_v50 = vld [vmem:[#allocation11_spill] sm:$0xff]  ;;  %v939_v28 = vpop.permute.xlu1 %938 }
 0x14e   : > { %1041 = vmatpush1.bf16.msra.mxu1 %v879_v23  ;;  %969 = vmatprep.subr.bf16.mxu0 %v874_v5  ;;  %v823_v41 = vmax.f32 %v751_v63, 0.0  ;;  %v735_v3 = vadd.f32 %v2268_v47, %v1912_v30  ;;  %v816_v35 = vmax.f32 %v2269_v48, 0.0  ;;  %v817_v43 = vmax.f32 %v632_v26, 0.0  ;;  %v2274_v30 = vld [vmem:[#allocation16_spill] sm:$0xff]  ;;  %v2277_v5 = vld [vmem:[#allocation18_spill] sm:$0xff]  ;;  %v2278_v23 = vld [vmem:[#allocation19_spill] sm:$0xff] }
 0x14f   : > { %1042 = vmatprep.subr.bf16.mxu1 %v876_v2  ;;  %v869_v31 = vpack.c.bf16 %v825_v51, %v821_v58  ;;  %v810_v9 = vmax.f32 %v2270_v55, 0.0  ;;  %v819_v15 = vmax.f32 %v745_v59, 0.0  ;;  %v866_v16 = vpack.c.bf16 %v818_v7, %v814_v33  ;;  %v2282_v2 = vld [vmem:[#allocation13_spill] sm:$0xff]  ;;  %v2283_v63 = vld [vmem:[#allocation10_spill] sm:$0xff]  ;;  %v1495_v56 = vld [vmem:[%s2229_s3 + $0x10] sm:$0xff]   ;;  %v934_v58 = vpop.permute.xlu0 %933 }
 0x150   : > { %v871_v19 = vpack.c.bf16 %v827_v8, %v823_v41  ;;  %v618_v24 = vadd.f32 %v2272_v27, %v2271_v1  ;;  %v812_v22 = vmax.f32 %v2273_v17, 0.0  ;;  %v813_v18 = vmax.f32 %v628_v25, 0.0  ;;  %v1493_v26 = vld [vmem:[%s2229_s3] sm:$0xff]   ;;  %v1494_v59 = vld [vmem:[%s2229_s3 + $0x8] sm:$0xff]   ;;  %v1496_v51 = vld [vmem:[%s2229_s3 + $0x18] sm:$0xff]  }
 0x151   : > { %970 = vmatpush1.bf16.msra.mxu0 %v873_v60  ;;  %v868_v21 = vpack.c.bf16 %v820_v40, %v816_v35  ;;  %v731_v61 = vadd.f32 %v2274_v30, %v2271_v1  ;;  %v806_v38 = vmax.f32 %v2275_v42, 0.0  ;;  %v815_v37 = vmax.f32 %v741_v12, 0.0 }
 0x152   : > { %1043 = vmatpush1.bf16.msra.mxu1 %v875_v10  ;;  %971 = vmatprep.subr.bf16.mxu0 %v870_v52  ;;  %v808_v20 = vmax.f32 %v2276_v39, 0.0  ;;  %v809_v0 = vmax.f32 %v622_v53, 0.0  ;;  %v865_v29 = vpack.c.bf16 %v817_v43, %v813_v18  ;;  %v811_v34 = vmax.f32 %v735_v3, 0.0  ;;  %v929_v3 = vpop.permute.xlu1 %928 }
 0x153   : > { %1044 = vmatprep.subr.bf16.mxu1 %v872_v11  ;;  %v862_v44 = vpack.c.bf16 %v810_v9, %v806_v38  ;;  %v867_v57 = vpack.c.bf16 %v819_v15, %v815_v37  ;;  %v805_v32 = vmax.f32 %v618_v24, 0.0  ;;  %v807_v49 = vmax.f32 %v731_v61, 0.0  ;;  %v924_v41 = vpop.permute.xlu0 %923 }
 0x154   : > { %v864_v4 = vpack.c.bf16 %v812_v22, %v808_v20  ;;  %v2285_v54 = vmov 0  }
 0x155   : > { %972 = vmatpush1.bf16.msra.mxu0 %v869_v31  ;;  %v861_v45 = vpack.c.bf16 %v809_v0, %v805_v32  ;;  %v863_v62 = vpack.c.bf16 %v811_v34, %v807_v49 }
 0x156   : > { %1045 = vmatpush1.bf16.msra.mxu1 %v871_v19  ;;  %973 = vmatprep.subr.bf16.mxu0 %v866_v16  ;;  %v919_v16 = vpop.permute.xlu1 %918 }
 0x157   : > { %1046 = vmatprep.subr.bf16.mxu1 %v868_v21  ;;  %v2114_v9 = vpop.permute.xlu0 %913 }
 0x159   : > { %974 = vmatpush1.bf16.msra.mxu0 %v865_v29 }
 0x15a   : > { %1047 = vmatpush1.bf16.msra.mxu1 %v867_v57  ;;  %975 = vmatprep.subr.bf16.mxu0 %v862_v44  ;;  %v2118_v21 = vpop.permute.xlu1 %908 }
 0x15b   : > { %1048 = vmatprep.subr.bf16.mxu1 %v864_v4  ;;  %v2116_v22 = vpop.permute.xlu0 %903 }
 0x15d   : > { %976 = vmatpush1.bf16.msra.mxu0 %v861_v45 }
 0x15e   : > { %1049 = vmatpush1.bf16.msra.mxu1 %v863_v62  ;;  %977 = vmatprep.subr.bf16.mxu0 %v2277_v5 }
 0x15f   : > { %1050 = vmatprep.subr.bf16.mxu1 %v2278_v23 }
 0x161   : > { %978 = vmatpush1.bf16.msra.mxu0 %v2279_v36 }
 0x162   : > { %1051 = vmatpush1.bf16.msra.mxu1 %v2280_v6  ;;  %979 = vmatprep.subr.bf16.mxu0 %v2281_v14 }
 0x163   : > { %1052 = vmatprep.subr.bf16.mxu1 %v2282_v2 }
 0x165   : > { %980 = vmatpush1.bf16.msra.mxu0 %v2283_v63 }
 0x166   : > { %1053 = vmatpush1.bf16.msra.mxu1 %v2284_v50 }
 0x168   : > { %998 = vmatmul.mubr.bf16.vlgmr.msra.gmra.mxu0 %v1493_v26 }
 0x169   : > { %1071 = vmatmul.mubr.bf16.vlgmr.msra.gmra.mxu1 %v1493_v26  ;;  %1007 = vmatprep.mubr.bf16.mxu0 %v2285_v54 }
 0x16a   : > { %1080 = vmatprep.mubr.bf16.mxu1 %v2285_v54 }
 0x170   : > { %1008 = vmatmul.mubr.bf16.gmra.mxu0 %v1494_v59 }
 0x171   : > { %1081 = vmatmul.mubr.bf16.gmra.mxu1 %v1494_v59  ;;  %1017 = vmatprep.mubr.bf16.mxu0 %v2285_v54 }
 0x172   : > { %1090 = vmatprep.mubr.bf16.mxu1 %v2285_v54 }
 0x178   : > { %1018 = vmatmul.mubr.bf16.gmra.mxu0 %v1495_v56 }
 0x179   : > { %1091 = vmatmul.mubr.bf16.gmra.mxu1 %v1495_v56  ;;  %1027 = vmatprep.mubr.bf16.mxu0 %v2285_v54 }
 0x17a   : > { %1100 = vmatprep.mubr.bf16.mxu1 %v2285_v54 }
 0x180   : > { %1028 = vmatmul.mubr.bf16.gmra.mxu0 %v1496_v51 }
 0x181   : > { %1101 = vmatmul.mubr.bf16.gmra.mxu1 %v1496_v51  ;;  %1201 = vmatprep.mubr.bf16.mxu0 %v2285_v54 }
 0x182   : > { %1242 = vmatprep.mubr.bf16.mxu1 %v2285_v54 }
 0x228   : > { %v2102_v60 = vpop.f32.mrf.mxu0 }
 0x229   : > { %v2104_v7 = vpop.f32.mrf.mxu1 }
 0x22a   : > { %v1001_v8 = vpop.f32.mrf.mxu0 }
 0x22b   : > { %v1074_v52 = vpop.f32.mrf.mxu1  ;;  %v2121_v30 = vadd.f32 %v1001_v8, %v2116_v22 }
 0x22c   : > { %v2106_v10 = vpop.f32.mrf.mxu0  ;;  %v2124_v61 = vadd.f32 %v1074_v52, %v2116_v22 }
 0x22d   : > { %v2108_v25 = vpop.f32.mrf.mxu1 }
 0x22e   : > { %v1005_v40 = vpop.f32.mrf.mxu0 }
 0x22f   : > { %v1078_v11 = vpop.f32.mrf.mxu1  ;;  %v2127_v38 = vadd.f32 %v1005_v40, %v2118_v21 }
 0x230   : > { %v2110_v53 = vpop.f32.mrf.mxu0  ;;  %v2130_v37 = vadd.f32 %v1078_v11, %v2118_v21 }
 0x231   : > { %v2112_v46 = vpop.f32.mrf.mxu1 }
 0x232   : > { %v1011_v12 = vpop.f32.mrf.mxu0 }
 0x233   : > { %v1084_v13 = vpop.f32.mrf.mxu1  ;;  %v2133_v39 = vadd.f32 %v1011_v12, %v2114_v9 }
 0x234   : > { %v1013_v33 = vpop.f32.mrf.mxu0  ;;  %v2136_v20 = vadd.f32 %v1084_v13, %v2114_v9 }
 0x235   : > { %v1086_v47 = vpop.f32.mrf.mxu1  ;;  %v2138_v29 = vadd.f32 %v1013_v33, %v919_v16 }
 0x236   : > { %v1015_v48 = vpop.f32.mrf.mxu0  ;;  %v2140_v34 = vadd.f32 %v1086_v47, %v919_v16 }
 0x237   : > { %v1088_v35 = vpop.f32.mrf.mxu1  ;;  %v2142_v44 = vadd.f32 %v1015_v48, %v919_v16 }
 0x238   : > { %v1019_v43 = vpop.f32.mrf.mxu0  ;;  %v2144_v57 = vadd.f32 %v1088_v35, %v919_v16 }
 0x239   : > { %v1092_v31 = vpop.f32.mrf.mxu1  ;;  %v1020_v4 = vadd.f32 %v1019_v43, %v924_v41 }
 0x23a   : > { %v1021_v55 = vpop.f32.mrf.mxu0  ;;  %v1093_v43 = vadd.f32 %v1092_v31, %v924_v41  ;;  %v1004_v31 = vadd.f32 %v2106_v10, %v2118_v21  ;;  %v1125_v10 = vmax.f32 %v2140_v34, 0.0 }
 0x23b   : > { %v1094_v15 = vpop.f32.mrf.mxu1  ;;  %v1022_v26 = vadd.f32 %v1021_v55, %v924_v41 }
 0x23c   : > { %v1023_v19 = vpop.f32.mrf.mxu0  ;;  %v1095_v63 = vadd.f32 %v1094_v15, %v924_v41 }
 0x23d   : > { %v1096_v1 = vpop.f32.mrf.mxu1  ;;  %v1024_v56 = vadd.f32 %v1023_v19, %v929_v3  ;;  %v1128_v16 = vmax.f32 %v1022_v26, 0.0 }
 0x23e   : > { %v1025_v27 = vpop.f32.mrf.mxu0  ;;  %v1097_v51 = vadd.f32 %v1096_v1, %v929_v3  ;;  %v1130_v15 = vmax.f32 %v1095_v63, 0.0 }
 0x23f   : > { %v1098_v24 = vpop.f32.mrf.mxu1  ;;  %v1026_v49 = vadd.f32 %v1025_v27, %v929_v3 }
 0x240   : > { %v1029_v17 = vpop.f32.mrf.mxu0  ;;  %v1099_v23 = vadd.f32 %v1098_v24, %v929_v3  ;;  %v1124_v3 = vmax.f32 %v2142_v44, 0.0  ;;  %v1133_v19 = vmax.f32 %v1097_v51, 0.0  ;;  %v1120_v44 = vmax.f32 %v2133_v39, 0.0 }
 0x241   : > { %v1102_v18 = vpop.f32.mrf.mxu1  ;;  %v1030_v36 = vadd.f32 %v1029_v17, %v934_v58  ;;  %v1132_v40 = vmax.f32 %v1026_v49, 0.0  ;;  %v1129_v49 = vmax.f32 %v1093_v43, 0.0  ;;  %v1118_v39 = vmax.f32 %v2130_v37, 0.0 }
 0x242   : > { %v1031_v42 = vpop.f32.mrf.mxu0  ;;  %v1103_v50 = vadd.f32 %v1102_v18, %v934_v58  ;;  %v1134_v33 = vmax.f32 %v1099_v23, 0.0  ;;  %v1010_v18 = vadd.f32 %v2110_v53, %v2114_v9  ;;  %v1077_v53 = vadd.f32 %v2108_v25, %v2118_v21 }
 0x243   : > { %v1104_v0 = vpop.f32.mrf.mxu1  ;;  %v1032_v45 = vadd.f32 %v1031_v42, %v934_v58  ;;  %v1135_v47 = vmax.f32 %v1030_v36, 0.0  ;;  %v1126_v42 = vmax.f32 %v2144_v57, 0.0  ;;  %v1122_v57 = vmax.f32 %v2136_v20, 0.0 }
 0x244   : > { %v1033_v32 = vpop.f32.mrf.mxu0  ;;  %v1105_v6 = vadd.f32 %v1104_v0, %v934_v58  ;;  %v1137_v27 = vmax.f32 %v1103_v50, 0.0  ;;  %v1131_v58 = vmax.f32 %v1024_v56, 0.0  ;;  %v1127_v0 = vmax.f32 %v1020_v4, 0.0 }
 0x245   : > { %v1034_v62 = vadd.f32 %v1033_v32, %v939_v28  ;;  %v1106_v5 = vpop.f32.mrf.mxu1  ;;  %v1136_v11 = vmax.f32 %v1032_v45, 0.0  ;;  %v1154_v41 = vpack.c.bf16 %v1134_v33, %v1130_v15  ;;  %v1083_v32 = vadd.f32 %v2112_v46, %v2114_v9 }
 0x246   : > { %v1107_v14 = vadd.f32 %v1106_v5, %v939_v28  ;;  %v1035_v2 = vpop.f32.mrf.mxu0  ;;  %v1138_v48 = vmax.f32 %v1105_v6, 0.0  ;;  %v1123_v4 = vmax.f32 %v2138_v29, 0.0  ;;  %v1151_v45 = vpack.c.bf16 %v1131_v58, %v1127_v0 }
 0x247   : > { %v1036_v54 = vadd.f32 %v1035_v2, %v939_v28  ;;  %v1108_v59 = vpop.f32.mrf.mxu1  ;;  %v1139_v8 = vmax.f32 %v1034_v62, 0.0  ;;  %v1116_v62 = vmax.f32 %v2127_v38, 0.0  ;;  %v1148_v5 = vpack.c.bf16 %v1124_v3, %v1120_v44 }
 0x248   : > { %v1109_v52 = vadd.f32 %v1108_v59, %v939_v28  ;;  %v1141_v12 = vmax.f32 %v1107_v14, 0.0  ;;  %v1152_v28 = vpack.c.bf16 %v1132_v40, %v1128_v16  ;;  %v1153_v46 = vpack.c.bf16 %v1133_v19, %v1129_v49 }
 0x249   : > { %v1140_v13 = vmax.f32 %v1036_v54, 0.0  ;;  %v1155_v24 = vpack.c.bf16 %v1139_v8, %v1135_v47  ;;  %v1000_v9 = vadd.f32 %v2102_v60, %v2116_v22  ;;  %v1119_v23 = vmax.f32 %v1010_v18, 0.0 }
 0x24a   : > { %v1142_v35 = vmax.f32 %v1109_v52, 0.0  ;;  %v1157_v1 = vpack.c.bf16 %v1141_v12, %v1137_v27  ;;  %v1150_v36 = vpack.c.bf16 %v1126_v42, %v1122_v57  ;;  %v1073_v25 = vadd.f32 %v2104_v7, %v2116_v22 }
 0x24b   : > { %v1156_v55 = vpack.c.bf16 %v1140_v13, %v1136_v11  ;;  %v1112_v21 = vmax.f32 %v2121_v30, 0.0  ;;  %v1121_v20 = vmax.f32 %v1083_v32, 0.0  ;;  %v1114_v38 = vmax.f32 %v2124_v61, 0.0  ;;  %v1159_v30 = vld [vmem:[%s2231_s5] sm:$0xf]  ;;  %v1164_v61 = vpop.permute.xlu0 %1163 }
 0x24c   : > { %v1158_v17 = vpack.c.bf16 %v1142_v35, %v1138_v48  ;;  %v1115_v29 = vmax.f32 %v1004_v31, 0.0  ;;  %v1147_v34 = vpack.c.bf16 %v1123_v4, %v1119_v23  ;;  %v1117_v6 = vmax.f32 %v1077_v53, 0.0 }
 0x24d   : > { %1177 = vmatprep.subr.bf16.mxu0 %v1156_v55  ;;  %v1144_v60 = vpack.c.bf16 %v1116_v62, %v1112_v21  ;;  %v1149_v37 = vpack.c.bf16 %v1125_v10, %v1121_v20  ;;  %v1111_v14 = vmax.f32 %v1000_v9, 0.0  ;;  %v1146_v2 = vpack.c.bf16 %v1118_v39, %v1114_v38 }
 0x24e   : > { %1218 = vmatprep.subr.bf16.mxu1 %v1158_v17  ;;  %1178 = vmatpush1.bf16.msra.mxu0 %v1155_v24  ;;  %v1113_v26 = vmax.f32 %v1073_v25, 0.0 }
 0x24f   : > { %1219 = vmatpush1.bf16.msra.mxu1 %v1157_v1  ;;  %1179 = vmatprep.subr.bf16.mxu0 %v1152_v28  ;;  %v1143_v7 = vpack.c.bf16 %v1115_v29, %v1111_v14 }
 0x250   : > { %1220 = vmatprep.subr.bf16.mxu1 %v1154_v41  ;;  %v1145_v22 = vpack.c.bf16 %v1117_v6, %v1113_v26 }
 0x252   : > { %1180 = vmatpush1.bf16.msra.mxu0 %v1151_v45 }
 0x253   : > { %1221 = vmatpush1.bf16.msra.mxu1 %v1153_v46  ;;  %1181 = vmatprep.subr.bf16.mxu0 %v1148_v5 }
 0x254   : > { %1222 = vmatprep.subr.bf16.mxu1 %v1150_v36 }
 0x256   : > { %1182 = vmatpush1.bf16.msra.mxu0 %v1147_v34 }
 0x257   : > { %1223 = vmatpush1.bf16.msra.mxu1 %v1149_v37  ;;  %1183 = vmatprep.subr.bf16.mxu0 %v1144_v60 }
 0x258   : > { %1224 = vmatprep.subr.bf16.mxu1 %v1146_v2 }
 0x25a   : > { %1184 = vmatpush1.bf16.msra.mxu0 %v1143_v7 }
 0x25b   : > { %1225 = vmatpush1.bf16.msra.mxu1 %v1145_v22 }
 0x25d   : > { %1408 = vmatmul.mubr.msk.bf16.vlgmr.msra.gmra.mxu0 %vm538_vm0, %v1159_v30 }
 0x25e   : > { %1409 = vmatmul.mubr.msk.bf16.vlgmr.msra.gmra.mxu1 %vm538_vm0, %v1159_v30 }
 0x31d   : > { %v1203_v63 = vpop.f32.mrf.mxu0 }
 0x31e   : > { %v1204_v50 = vadd.f32 %v1203_v63, %v1164_v61  ;;  %v1244_v54 = vpop.f32.mrf.mxu1 }
 0x31f   : > { %v1245_v59 = vadd.f32 %v1244_v54, %v1164_v61  ;;  %v1205_v56 = vpop.f32.mrf.mxu0 }
 0x320   : > { %1251 = vst [vmem:[%s329_s23] sm:$0xff] %v1204_v50  ;;  %v1206_v51 = vadd.f32 %v1205_v56, %v1164_v61  ;;  %v1246_v8 = vpop.f32.mrf.mxu1 }
 0x321   : > { %1253 = vst [vmem:[%s329_s23 + $0x10] sm:$0xff] %v1245_v59  ;;  %v1247_v52 = vadd.f32 %v1246_v8, %v1164_v61  ;;  %v1207_v40 = vpop.f32.mrf.mxu0 }
 0x322   : > { %1252 = vst [vmem:[%s329_s23 + $0x8] sm:$0xff] %v1206_v51  ;;  %v1248_v11 = vpop.f32.mrf.mxu1 }
 0x323   : > { %1254 = vst [vmem:[%s329_s23 + $0x18] sm:$0xff] %v1247_v52  ;;  %v1208_v12 = vpop.f32.mrf.mxu0 }
 0x324   : > { %v1249_v13 = vpop.f32.mrf.mxu1 }
 0x325   : > { %1538 = shalt.err (!%p1535_p7)
}
 0x326   : > { %s1539_s11 = scalar_lea.hbm %s2178_s8, 512  ;;  %s1543_s19 = scalar_lea.hbm %s2233_s7, 1024 }
 0x327   : > { %p1540_p10 = scmp.ne.s32.totalorder %s2178_s8, %s1539_s11  ;;  %p1544_p2 = scmp.lt.s32.totalorder %s2178_s8, %s2233_s7 }
 0x328   : > { %p1545_p8 = scmp.lt.s32.totalorder %s1543_s19, %s1539_s11 }
 0x329   : > { %p1541_p4 = pnand %p1540_p10, %p1703_p9 }
 0x32a   : > { %p1546_p12 = por %p1545_p8, %p1544_p2 }
 0x32b   : > { %p1542_p13 = pneg %p1541_p4 }
 0x32d   : > { %p1547_p0 = pnand %p1546_p12, %p1542_p13 }
 0x32f   : > { %1550 = shalt.err (!%p1547_p0)
}
 0x330   : > { %1420 = dma.vmem_to_hbm [thread:$0]  (%p1703_p9), %s2180_s13, 512, %s2178_s8, %s1256_s27  }
 0x331 PF: > { %s1284_s22 = sand.u32 1, %s1585_s24   ;;  %p2286_p1 = scmp.ge.s32.totalorder %s1605_s29, 2 }
 0x332   : > { %s1285_s30 = scalar_lea.sflag [#allocation4], %s1284_s22 }
 0x333   : > { %p1427_p3 = pnand %p2286_p1, %p1710_p11 }
 0x335   : > { %p1428_p5 = pneg %p1427_p3 }
 0x337   : > { %1580 = dma.done.wait (%p1428_p5), %s1285_s30, 512  }
 0x338   : > { %1582 = vsyncadd (%p1428_p5), %s1285_s30, 4294966784  ;;  %s23_s29 = sadd.s32 1, %s1605_s29   ;;  %s2287_s14 = sld [smem:[#allocation8_spill]] }
 0x339   : > { %p20_p6 = scmp.ge.s32.totalorder %s23_s29, 4   ;;  %s2288_s24 = smov %s1589_s25 }
 0x33a   : > { %s2289_s25 = smov %s1593_s26  ;;  %s2290_s26 = smov %s1708_s15 }
 0x33b   : > { %s2291_s27 = smov %s1601_s28  ;;  %22 = sbr.rel (!%p20_p6) target bundleno = 6 (0x6), region = 96 }
 0x33e   : > { %s2292_s28 = smov %s2287_s14 }
 0x340   :  { %1290 = vsyncpa [#allocation3], 1 }
 0x341   :  { %1292 = vsyncpa [#allocation3 + $0x1], 1 }
 0x342   :  { %1293 = vsyncpa [#allocation4], 1 }
 0x343   :  { %1295 = vsyncpa [#allocation4 + $0x1], 1 }

</bundles_post_ra>
